<compile_context>
chip_gen: v7x
topology: tpu7x:2x2x1
jax: 0.10.0
libtpu: 0.0.40
codegen_flags: <defaults>
</compile_context>

<pallas_src>
import functools

import jax
import jax.numpy as jnp
from jax.experimental import pallas as pl
from jax.experimental.pallas import tpu as pltpu


def _conv_relu_kernel(x_ref, w_ref, b_ref, col_ref, o_ref, pat_ref, *, width):
    """One (batch, row-tile) step of 3x3 conv (pad=1, stride=1) + bias + ReLU.

    x_ref  : (1, Cin, Lp)   flat image, zero-padded by (W+1) on both flat ends
    w_ref  : (Cout, 9*Cin)  weights, contraction axis ordered (ky, kx, cin)
    b_ref  : (Cout, 1)      bias
    col_ref: (1, T)         column index (w = p mod W) of each output lane
    o_ref  : (1, Cout, T)   output tile, T = row_tile * W  (lane-dense)
    pat_ref: (9*Cin, T)     VMEM scratch holding the im2col patch matrix
    """
    cin = x_ref.shape[1]
    T = o_ref.shape[2]
    W = width

    t = pl.program_id(1)
    # Halo'd flat window for this row tile.  start is a multiple of T (T is a
    # multiple of 128 whenever possible), so the dynamic load is lane-aligned.
    start = pl.multiple_of(t * T, T)
    win = T + 2 * W + 2
    window = x_ref[0, :, pl.ds(start, win)]           # (Cin, T + 2W + 2)

    col = col_ref[...]                                 # (1, T) int32
    mask_l = col >= 1                                  # tap dx = -1 validity
    mask_r = col <= (W - 2)                            # tap dx = +1 validity

    # Pack the im2col patch matrix: 9 static lane-shifted slices of the window,
    # W-direction padding fused via the column masks.  No reshapes/relayouts.
    for ky in range(3):
        for kx in range(3):
            dy, dx = ky - 1, kx - 1
            off = (dy + 1) * W + dx + 1                # static, in [0, 2W+2]
            patch = window[:, off:off + T]             # (Cin, T)
            if dx == -1:
                patch = jnp.where(mask_l, patch, 0.0)
            elif dx == 1:
                patch = jnp.where(mask_r, patch, 0.0)
            tap = ky * 3 + kx
            pat_ref[pl.ds(tap * cin, cin), :] = patch

    # Single MXU matmul: (Cout, 9*Cin) @ (9*Cin, T) -> (Cout, T), f32 accum.
    acc = jnp.dot(w_ref[...], pat_ref[...], preferred_element_type=jnp.float32)
    acc = acc + b_ref[...].astype(jnp.float32)
    acc = jnp.maximum(acc, 0.0)                        # ReLU
    o_ref[0] = acc.astype(o_ref.dtype)


def _pick_row_tile(H, W):
    # Smallest row tile whose flat width (row_tile * W) is a multiple of 128
    # (lane-aligned output blocks, more grid steps).  Falls back to full image.
    # For large images, pass a bigger row_tile (T ~ 512-2048 lanes) to amortize
    # per-step overhead.
    for r in range(1, H + 1):
        if H % r == 0 and (r * W) % 128 == 0:
            return r
    return H


@functools.partial(jax.jit, static_argnames=("row_tile",))
def conv_relu(x_nchw, weight, bias, *, row_tile=None):
    """Conv2d(k=3, s=1, p=1) + ReLU; NCHW in / NCHW out (PyTorch semantics).

    x_nchw: (B, Cin, H, W); weight: (Cout, Cin, 3, 3); bias: (Cout,)
    """
    B, Cin, H, W = x_nchw.shape
    Cout = weight.shape[0]
    HW = H * W

    if row_tile is None:
        row_tile = _pick_row_tile(H, W)
    assert H % row_tile == 0
    T = row_tile * W
    n_t = H // row_tile

    # Glue (layout-free): flatten spatial dims (free reshape, stays NCHW) and
    # zero-pad the flat axis by W+1 on each side (realizes the H-direction
    # halo so every tap is a contiguous flat slice).  W-direction padding is
    # fused into the kernel via column masks.
    # TODO(synk): fold this H-halo pad into the kernel (manual halo DMA) to
    # remove the one remaining extra HBM pass over the input.
    x_flat = x_nchw.reshape(B, Cin, HW)
    xp = jnp.pad(x_flat, ((0, 0), (0, 0), (W + 1, W + 1)))
    Lp = HW + 2 * (W + 1)

    # Weights -> (Cout, 9*Cin) with K ordered (ky, kx, cin); bias -> (Cout, 1).
    w2 = jnp.transpose(weight, (0, 2, 3, 1)).reshape(Cout, 9 * Cin)
    b2 = bias.reshape(Cout, 1)
    # Column index of each output lane within its row (tiny constant input).
    col = jnp.tile(jnp.arange(W, dtype=jnp.int32), row_tile).reshape(1, T)

    kernel = functools.partial(_conv_relu_kernel, width=W)

    itemsize = jnp.dtype(x_nchw.dtype).itemsize
    cost = pl.CostEstimate(
        flops=2 * B * HW * 9 * Cin * Cout,
        transcendentals=0,
        bytes_accessed=(B * Cin * Lp + Cout * 9 * Cin + Cout + B * Cout * HW)
        * itemsize,
    )

    out_flat = pl.pallas_call(
        kernel,
        out_shape=jax.ShapeDtypeStruct((B, Cout, HW), x_nchw.dtype),
        grid=(B, n_t),
        in_specs=[
            # Whole (padded, flat) image stays resident across the row-tile
            # axis; it is re-DMA'd only when the batch index changes.
            # TODO(synk): for large H*W*Cin, switch to per-tile halo DMA
            # (memory_space=pl.ANY + make_async_copy) to bound VMEM on v7x.
            pl.BlockSpec((1, Cin, Lp), lambda b, t: (b, 0, 0)),
            pl.BlockSpec((Cout, 9 * Cin), lambda b, t: (0, 0)),
            pl.BlockSpec((Cout, 1), lambda b, t: (0, 0)),
            pl.BlockSpec((1, T), lambda b, t: (0, 0)),
        ],
        out_specs=pl.BlockSpec((1, Cout, T), lambda b, t: (b, 0, t)),
        scratch_shapes=[pltpu.VMEM((9 * Cin, T), x_nchw.dtype)],
        compiler_params=pltpu.CompilerParams(
            dimension_semantics=("parallel", "parallel"),
            vmem_limit_bytes=32 * 1024 * 1024,
        ),
        cost_estimate=cost,
    )(xp, w2, b2, col)

    # Free reshape back to (B, Cout, H, W) -- no output transpose pass.
    return out_flat.reshape(B, Cout, H, W)


def _reference_conv_relu(x_nchw, weight, bias):
    # Pure-JAX reference (XLA conv) for correctness checking.
    out = jax.lax.conv_general_dilated(
        x_nchw.astype(jnp.float32),
        weight.astype(jnp.float32),
        window_strides=(1, 1),
        padding=((1, 1), (1, 1)),
        dimension_numbers=("NCHW", "OIHW", "NCHW"),
    )
    out = out + bias.reshape(1, -1, 1, 1)
    return jnp.maximum(out, 0.0)


if __name__ == "__main__":
    key = jax.random.PRNGKey(0)
    k_x, k_w, k_b = jax.random.split(key, 3)

    # Small shapes consistent with ConvRelu(in_depth=4, out_depth=8).
    B, Cin, Cout, H, W = 2, 4, 8, 16, 16

    x = jax.random.normal(k_x, (B, Cin, H, W), dtype=jnp.float32)
    fan_in = Cin * 3 * 3
    bound = 1.0 / (fan_in ** 0.5)
    weight = jax.random.uniform(k_w, (Cout, Cin, 3, 3), jnp.float32, -bound, bound)
    bias = jax.random.uniform(k_b, (Cout,), jnp.float32, -bound, bound)

    out = conv_relu(x, weight, bias)
    out = jax.block_until_ready(out)

    ref = _reference_conv_relu(x, weight, bias)
    assert out.shape == (B, Cout, H, W)
    assert jnp.allclose(out, ref, atol=1e-4, rtol=1e-4), "mismatch vs reference"

    print("KERNEL_OK")
</pallas_src>

<mosaic_0001>
module attributes {stable_mosaic.version = 11 : i64} {
  func.func @_conv_relu_kernel(%arg0: i32, %arg1: i32, %arg2: memref<1x4x290xf32, #tpu.memory_space<vmem>>, %arg3: memref<8x36xf32, #tpu.memory_space<vmem>>, %arg4: memref<8x1xf32, #tpu.memory_space<vmem>>, %arg5: memref<1x128xi32, #tpu.memory_space<vmem>>, %arg6: memref<1x8x128xf32, #tpu.memory_space<vmem>>, %arg7: memref<36x128xf32, #tpu.memory_space<vmem>>) attributes {dimension_semantics = [#tpu.dimension_semantics<parallel>, #tpu.dimension_semantics<parallel>], iteration_bounds = array<i64: 2, 2>, scalar_prefetch = 0 : i64, scratch_operands = 1 : i64, tpu.core_type = #tpu.core_type<tc>, window_params = [{transform_indices = @transform_0, window_bounds = array<i64: 1, 4, 290>}, {pipeline_mode = #tpu.pipeline_mode<synchronous>, transform_indices = @transform_1, window_bounds = array<i64: 8, 36>}, {pipeline_mode = #tpu.pipeline_mode<synchronous>, transform_indices = @transform_2, window_bounds = array<i64: 8, 1>}, {pipeline_mode = #tpu.pipeline_mode<synchronous>, transform_indices = @transform_3, window_bounds = array<i64: 1, 128>}, {transform_indices = @transform_4, window_bounds = array<i64: 1, 8, 128>}]} {
    %c128_i32 = arith.constant 128 : i32
    %0 = arith.muli %arg1, %c128_i32 : i32
    %1 = tpu.assume_multiple %0, 128 : i32
    %c0 = arith.constant 0 : index
    %c0_0 = arith.constant 0 : index
    %2 = arith.index_cast %1 : i32 to index
    %3 = vector.load %arg2[%c0, %c0_0, %2] : memref<1x4x290xf32, #tpu.memory_space<vmem>>, vector<1x4x162xf32>
    %4 = vector.shape_cast %3 : vector<1x4x162xf32> to vector<4x162xf32>
    %c0_1 = arith.constant 0 : index
    %c0_2 = arith.constant 0 : index
    %5 = vector.load %arg5[%c0_1, %c0_2] : memref<1x128xi32, #tpu.memory_space<vmem>>, vector<1x128xi32>
    %c1_i32 = arith.constant 1 : i32
    %6 = vector.broadcast %c1_i32 : i32 to vector<1x128xi32>
    %7 = arith.cmpi sge, %5, %6 : vector<1x128xi32>
    %c14_i32 = arith.constant 14 : i32
    %8 = vector.broadcast %c14_i32 : i32 to vector<1x128xi32>
    %9 = arith.cmpi sle, %5, %8 : vector<1x128xi32>
    %10 = vector.extract_strided_slice %4 {offsets = [0, 0], sizes = [4, 128], strides = [1, 1]} : vector<4x162xf32> to vector<4x128xf32>
    %cst = arith.constant 0.000000e+00 : f32
    %11 = vector.shape_cast %7 : vector<1x128xi1> to vector<1x128xi1>
    %12 = vector.broadcast %11 : vector<1x128xi1> to vector<4x128xi1>
    %13 = vector.broadcast %cst : f32 to vector<4x128xf32>
    %14 = arith.select %12, %10, %13 : vector<4x128xi1>, vector<4x128xf32>
    %c0_3 = arith.constant 0 : index
    %c0_4 = arith.constant 0 : index
    %15 = vector.load %arg7[%c0_3, %c0_4] : memref<36x128xf32, #tpu.memory_space<vmem>>, vector<4x128xf32>
    tpu.vector_store %arg7[%c0_3, %c0_4], %14 {strides = array<i32>} : memref<36x128xf32, #tpu.memory_space<vmem>>, vector<4x128xf32>,
    %16 = vector.extract_strided_slice %4 {offsets = [0, 1], sizes = [4, 128], strides = [1, 1]} : vector<4x162xf32> to vector<4x128xf32>
    %c4 = arith.constant 4 : index
    %c0_5 = arith.constant 0 : index
    %17 = vector.load %arg7[%c4, %c0_5] : memref<36x128xf32, #tpu.memory_space<vmem>>, vector<4x128xf32>
    tpu.vector_store %arg7[%c4, %c0_5], %16 {strides = array<i32>} : memref<36x128xf32, #tpu.memory_space<vmem>>, vector<4x128xf32>,
    %18 = vector.extract_strided_slice %4 {offsets = [0, 2], sizes = [4, 128], strides = [1, 1]} : vector<4x162xf32> to vector<4x128xf32>
    %cst_6 = arith.constant 0.000000e+00 : f32
    %19 = vector.shape_cast %9 : vector<1x128xi1> to vector<1x128xi1>
    %20 = vector.broadcast %19 : vector<1x128xi1> to vector<4x128xi1>
    %21 = vector.broadcast %cst_6 : f32 to vector<4x128xf32>
    %22 = arith.select %20, %18, %21 : vector<4x128xi1>, vector<4x128xf32>
    %c8 = arith.constant 8 : index
    %c0_7 = arith.constant 0 : index
    %23 = vector.load %arg7[%c8, %c0_7] : memref<36x128xf32, #tpu.memory_space<vmem>>, vector<4x128xf32>
    tpu.vector_store %arg7[%c8, %c0_7], %22 {strides = array<i32>} : memref<36x128xf32, #tpu.memory_space<vmem>>, vector<4x128xf32>,
    %24 = vector.extract_strided_slice %4 {offsets = [0, 16], sizes = [4, 128], strides = [1, 1]} : vector<4x162xf32> to vector<4x128xf32>
    %cst_8 = arith.constant 0.000000e+00 : f32
    %25 = vector.shape_cast %7 : vector<1x128xi1> to vector<1x128xi1>
    %26 = vector.broadcast %25 : vector<1x128xi1> to vector<4x128xi1>
    %27 = vector.broadcast %cst_8 : f32 to vector<4x128xf32>
    %28 = arith.select %26, %24, %27 : vector<4x128xi1>, vector<4x128xf32>
    %c12 = arith.constant 12 : index
    %c0_9 = arith.constant 0 : index
    %29 = vector.load %arg7[%c12, %c0_9] : memref<36x128xf32, #tpu.memory_space<vmem>>, vector<4x128xf32>
    tpu.vector_store %arg7[%c12, %c0_9], %28 {strides = array<i32>} : memref<36x128xf32, #tpu.memory_space<vmem>>, vector<4x128xf32>,
    %30 = vector.extract_strided_slice %4 {offsets = [0, 17], sizes = [4, 128], strides = [1, 1]} : vector<4x162xf32> to vector<4x128xf32>
    %c16 = arith.constant 16 : index
    %c0_10 = arith.constant 0 : index
    %31 = vector.load %arg7[%c16, %c0_10] : memref<36x128xf32, #tpu.memory_space<vmem>>, vector<4x128xf32>
    tpu.vector_store %arg7[%c16, %c0_10], %30 {strides = array<i32>} : memref<36x128xf32, #tpu.memory_space<vmem>>, vector<4x128xf32>,
    %32 = vector.extract_strided_slice %4 {offsets = [0, 18], sizes = [4, 128], strides = [1, 1]} : vector<4x162xf32> to vector<4x128xf32>
    %cst_11 = arith.constant 0.000000e+00 : f32
    %33 = vector.shape_cast %9 : vector<1x128xi1> to vector<1x128xi1>
    %34 = vector.broadcast %33 : vector<1x128xi1> to vector<4x128xi1>
    %35 = vector.broadcast %cst_11 : f32 to vector<4x128xf32>
    %36 = arith.select %34, %32, %35 : vector<4x128xi1>, vector<4x128xf32>
    %c20 = arith.constant 20 : index
    %c0_12 = arith.constant 0 : index
    %37 = vector.load %arg7[%c20, %c0_12] : memref<36x128xf32, #tpu.memory_space<vmem>>, vector<4x128xf32>
    tpu.vector_store %arg7[%c20, %c0_12], %36 {strides = array<i32>} : memref<36x128xf32, #tpu.memory_space<vmem>>, vector<4x128xf32>,
    %38 = vector.extract_strided_slice %4 {offsets = [0, 32], sizes = [4, 128], strides = [1, 1]} : vector<4x162xf32> to vector<4x128xf32>
    %cst_13 = arith.constant 0.000000e+00 : f32
    %39 = vector.shape_cast %7 : vector<1x128xi1> to vector<1x128xi1>
    %40 = vector.broadcast %39 : vector<1x128xi1> to vector<4x128xi1>
    %41 = vector.broadcast %cst_13 : f32 to vector<4x128xf32>
    %42 = arith.select %40, %38, %41 : vector<4x128xi1>, vector<4x128xf32>
    %c24 = arith.constant 24 : index
    %c0_14 = arith.constant 0 : index
    %43 = vector.load %arg7[%c24, %c0_14] : memref<36x128xf32, #tpu.memory_space<vmem>>, vector<4x128xf32>
    tpu.vector_store %arg7[%c24, %c0_14], %42 {strides = array<i32>} : memref<36x128xf32, #tpu.memory_space<vmem>>, vector<4x128xf32>,
    %44 = vector.extract_strided_slice %4 {offsets = [0, 33], sizes = [4, 128], strides = [1, 1]} : vector<4x162xf32> to vector<4x128xf32>
    %c28 = arith.constant 28 : index
    %c0_15 = arith.constant 0 : index
    %45 = vector.load %arg7[%c28, %c0_15] : memref<36x128xf32, #tpu.memory_space<vmem>>, vector<4x128xf32>
    tpu.vector_store %arg7[%c28, %c0_15], %44 {strides = array<i32>} : memref<36x128xf32, #tpu.memory_space<vmem>>, vector<4x128xf32>,
    %46 = vector.extract_strided_slice %4 {offsets = [0, 34], sizes = [4, 128], strides = [1, 1]} : vector<4x162xf32> to vector<4x128xf32>
    %cst_16 = arith.constant 0.000000e+00 : f32
    %47 = vector.shape_cast %9 : vector<1x128xi1> to vector<1x128xi1>
    %48 = vector.broadcast %47 : vector<1x128xi1> to vector<4x128xi1>
    %49 = vector.broadcast %cst_16 : f32 to vector<4x128xf32>
    %50 = arith.select %48, %46, %49 : vector<4x128xi1>, vector<4x128xf32>
    %c32 = arith.constant 32 : index
    %c0_17 = arith.constant 0 : index
    %51 = vector.load %arg7[%c32, %c0_17] : memref<36x128xf32, #tpu.memory_space<vmem>>, vector<4x128xf32>
    tpu.vector_store %arg7[%c32, %c0_17], %50 {strides = array<i32>} : memref<36x128xf32, #tpu.memory_space<vmem>>, vector<4x128xf32>,
    %c0_18 = arith.constant 0 : index
    %c0_19 = arith.constant 0 : index
    %52 = vector.load %arg3[%c0_18, %c0_19] : memref<8x36xf32, #tpu.memory_space<vmem>>, vector<8x36xf32>
    %c0_20 = arith.constant 0 : index
    %c0_21 = arith.constant 0 : index
    %53 = vector.load %arg7[%c0_20, %c0_21] : memref<36x128xf32, #tpu.memory_space<vmem>>, vector<36x128xf32>
    %cst_22 = arith.constant dense<0.000000e+00> : vector<8x128xf32>
    %54 = tpu.matmul %52, %53, %cst_22 {dimension_numbers = #tpu.dot_dimension_numbers<[1], [0], [0], [1], [0, 0, 1, 1], [], []>} : vector<8x36xf32>, vector<36x128xf32>, vector<8x128xf32> -> vector<8x128xf32>
    %c0_23 = arith.constant 0 : index
    %c0_24 = arith.constant 0 : index
    %55 = vector.load %arg4[%c0_23, %c0_24] : memref<8x1xf32, #tpu.memory_space<vmem>>, vector<8x1xf32>
    %56 = vector.broadcast %55 : vector<8x1xf32> to vector<8x128xf32>
    %57 = arith.addf %54, %56 : vector<8x128xf32>
    %cst_25 = arith.constant 0.000000e+00 : f32
    %58 = vector.broadcast %cst_25 : f32 to vector<8x128xf32>
    %59 = arith.maximumf %57, %58 : vector<8x128xf32>
    %c0_26 = arith.constant 0 : index
    %c0_27 = arith.constant 0 : index
    %c0_28 = arith.constant 0 : index
    %60 = vector.load %arg6[%c0_26, %c0_27, %c0_28] : memref<1x8x128xf32, #tpu.memory_space<vmem>>, vector<1x8x128xf32>
    %61 = vector.shape_cast %60 : vector<1x8x128xf32> to vector<8x128xf32>
    %62 = vector.shape_cast %59 : vector<8x128xf32> to vector<1x8x128xf32>
    tpu.vector_store %arg6[%c0_26, %c0_27, %c0_28], %62 {strides = array<i32>} : memref<1x8x128xf32, #tpu.memory_space<vmem>>, vector<1x8x128xf32>,
    return
  }
  func.func @transform_0(%arg0: i32, %arg1: i32) -> (i32, i32, i32) {
    %c0_i32 = arith.constant 0 : i32
    %c0_i32_0 = arith.constant 0 : i32
    %c0_i32_1 = arith.constant 0 : i32
    return %arg0, %c0_i32, %c0_i32_0 : i32, i32, i32
  }
  func.func @transform_1(%arg0: i32, %arg1: i32) -> (i32, i32) {
    %c0_i32 = arith.constant 0 : i32
    %c0_i32_0 = arith.constant 0 : i32
    %c0_i32_1 = arith.constant 0 : i32
    return %c0_i32, %c0_i32_0 : i32, i32
  }
  func.func @transform_2(%arg0: i32, %arg1: i32) -> (i32, i32) {
    %c0_i32 = arith.constant 0 : i32
    %c0_i32_0 = arith.constant 0 : i32
    %c0_i32_1 = arith.constant 0 : i32
    return %c0_i32, %c0_i32_0 : i32, i32
  }
  func.func @transform_3(%arg0: i32, %arg1: i32) -> (i32, i32) {
    %c0_i32 = arith.constant 0 : i32
    %c0_i32_0 = arith.constant 0 : i32
    %c0_i32_1 = arith.constant 0 : i32
    return %c0_i32, %c0_i32_0 : i32, i32
  }
  func.func @transform_4(%arg0: i32, %arg1: i32) -> (i32, i32, i32) {
    %c0_i32 = arith.constant 0 : i32
    %c0_i32_0 = arith.constant 0 : i32
    return %arg0, %c0_i32, %arg1 : i32, i32, i32
  }
}

</mosaic_0001>

<bundles_post_ra>
// kernel: tile.9
= control target key start
LH: loop header
LB: loop body
LE: loop exit
PB: predicated region body
PF: predicated region fallthrough
CT: control target
= control target key end

     0   :  { %s67_s10 = smov 112   ;;  %s68_s11 = smov 80   ;;  %vm3_vm0 = vcmask 130048   ;;  %vm9_vm1 = vcmask 1048448   ;;  %vm15_vm2 = vcmask 917248   ;;  %vm21_vm3 = vcmask 786048   ;;  %s111_s0 = inlined_call_operand.vmem [shape: s32[8,16], index: 0, kind: input, shape index: {}]   ;;  %s112_s1 = inlined_call_operand.vmem [shape: s32[1,128], index: 1, kind: output, shape index: {}]  }
   0x1   :  { %v53_v0 = vld [vmem:[%s111_s0 + $0x7] sm:$0x1]   ;;  %v55_v1 = vld [vmem:[%s111_s0 + $0x5] sm:$0x1]   ;;  %v54_v2 = vld [vmem:[%s111_s0 + $0x6] sm:$0x1]  }
   0x2   :  { %7 = vrot.lane.b32.xlu0 %v53_v0, %s67_s10  ;;  %19 = vrot.lane.b32.xlu1 %v55_v1, %s68_s11  ;;  %v56_v3 = vld [vmem:[%s111_s0 + $0x4] sm:$0x1]   ;;  %v2_v4 = vld [vmem:[%s111_s0] sm:$0x1]   ;;  %s69_s18 = smov 96   ;;  %s70_s19 = smov 64  }
   0x3   :  { %4 = vst.msk [vmem:[#allocation0] sm:$0x1] %vm3_vm0, %v2_v4   ;;  %v57_v5 = vld [vmem:[%s111_s0 + $0x3] sm:$0x1]   ;;  %v58_v6 = vld [vmem:[%s111_s0 + $0x2] sm:$0x1]  }
   0x4   :  { %s71_s24 = smov 48   ;;  %s72_s25 = smov 32   ;;  %v59_v7 = vld [vmem:[%s111_s0 + $0x1] sm:$0x1]   ;;  %vm27_vm4 = vcmask 654848   ;;  %vm33_vm5 = vcmask 523648  }
   0x5   :  { %s73_s0 = smov 16   ;;  %vm39_vm6 = vcmask 392448   ;;  %vm45_vm7 = vcmask 261248  }
   0x6   :  { %13 = vrot.lane.b32.xlu0 %v54_v2, %s69_s18  ;;  %25 = vrot.lane.b32.xlu1 %v56_v3, %s70_s19 }
   0xa   :  { %31 = vrot.lane.b32.xlu0 %v57_v5, %s71_s24  ;;  %37 = vrot.lane.b32.xlu1 %v58_v6, %s72_s25 }
   0xe   :  { %43 = vrot.lane.b32.xlu0 %v59_v7, %s73_s0 }
  0x74   :  { %v8_v8 = vpop.permute.xlu0 %7   ;;  %v20_v9 = vpop.permute.xlu1 %19  }
  0x75   :  { %10 = vst.msk [vmem:[#allocation0] sm:$0x1] %vm9_vm1, %v8_v8  }
  0x78   :  { %v14_v10 = vpop.permute.xlu0 %13   ;;  %v26_v11 = vpop.permute.xlu1 %25  }
  0x79   :  { %16 = vst.msk [vmem:[#allocation0] sm:$0x1] %vm15_vm2, %v14_v10  }
  0x7a   :  { %22 = vst.msk [vmem:[#allocation0] sm:$0x1] %vm21_vm3, %v20_v9  }
  0x7b   :  { %28 = vst.msk [vmem:[#allocation0] sm:$0x1] %vm27_vm4, %v26_v11  }
  0x7c   :  { %v32_v12 = vpop.permute.xlu0 %31   ;;  %v38_v13 = vpop.permute.xlu1 %37  }
  0x7d   :  { %34 = vst.msk [vmem:[#allocation0] sm:$0x1] %vm33_vm5, %v32_v12  }
  0x7e   :  { %40 = vst.msk [vmem:[#allocation0] sm:$0x1] %vm39_vm6, %v38_v13  }
  0x80   :  { %v44_v14 = vpop.permute.xlu0 %43  }
  0x81   :  { %46 = vst.msk [vmem:[#allocation0] sm:$0x1] %vm45_vm7, %v44_v14  }
  0x88   :  { %v50_v15 = vld [vmem:[#allocation0] sm:$0x1] }
  0x89   :  { %52 = vst [vmem:[%s112_s1] sm:$0x1] %v50_v15 }

// kernel: conv_relu.1
= control target key start
LH: loop header
LB: loop body
LE: loop exit
PB: predicated region body
PF: predicated region fallthrough
CT: control target
= control target key end

     0   :  { %s657_s15 = smov 0   ;;  %s659_s16 = smov 0   ;;  %s746_s0 = inlined_call_operand.vmem [shape: f32[2,4,290], index: 0, kind: input, shape index: {}]   ;;  %s747_s1 = inlined_call_operand.vmem [shape: f32[8,36], index: 1, kind: input, shape index: {}]   ;;  %s748_s2 = inlined_call_operand.vmem [shape: f32[8,1], index: 2, kind: input, shape index: {}]   ;;  %s749_s3 = inlined_call_operand.vmem [shape: s32[1,128], index: 3, kind: input, shape index: {}]   ;;  %s750_s4 = inlined_call_operand.vmem [shape: f32[2,8,256], index: 4, kind: output, shape index: {}]  }
   0x1   :  { %s661_s17 = smov 0   ;;  %s663_s18 = smov 0  }
   0x2   :  { %s665_s19 = smov 0  }
   0x3 LB: > { %s23_s20 = sadd.s32 1, %s610_s17  ;;  %s26_s21 = sadd.s32 1, %s614_s18  ;;  %s618_s19 = sphi %s665_s19, %s14_s19   ;;  %s614_s18 = sphi %s663_s18, %s754_s18   ;;  %s610_s17 = sphi %s661_s17, %s753_s17   ;;  %s606_s16 = sphi %s659_s16, %s752_s16   ;;  %s602_s15 = sphi %s657_s15, %s751_s15  }
   0x4   : > { %p24_p0 = scmp.ge.s32.totalorder %s23_s20, 2  ;;  %p490_p1 = scmp.ge.s32.totalorder %s618_s19, 1 }
   0x5   : > { %p176_p2 = scmp.lt.s32.totalorder %s618_s19, 5 }
   0x6   : > { %s756_s20 = smov (%p24_p0, %s23_s20), 0  ;;  %s758_s21 = smov (!%p24_p0, %s26_s21), %s614_s18 }
   0x7   : > { %p177_p3 = pnand %p490_p1, %p176_p2  ;;  %p28_p4 = scmp.ge.s32.totalorder %s758_s21, 2 }
   0x8   : > { %p205_p5 = scmp.lt.s32.totalorder (!%p177_p3), %s606_s16, 1  ;;  %s494_s22 = sshll.u32 (!%p177_p3), %s602_s15, 7  ;;  %v224_v0 = vld [vmem:[%s749_s3] sm:$0x1] (!%p177_p3)  ;;  %v228_v1 = vlaneseq (!%p177_p3)  ;;  %v620_v2 = vmov (!%p177_p3), 0   ;;  %v624_v12 = vmov (!%p177_p3), 0.0|0.0  }
   0x9   : > { %s760_s21 = smov (%p28_p4, %s758_s21), 0  ;;  %180 = sbr.rel (%p177_p3) target bundleno = 394 (0x18a), region = 36 }
   0xa   : > { %s219_s25 = sshra.s32 (!%p177_p3), %s494_s22, 7  ;;  %vm225_vm0 = vcmp.ge.s32.totalorder (!%p177_p3), %v224_v0, 1  ;;  %vm226_vm1 = vcmp.le.s32.totalorder (!%p177_p3), %v224_v0, 14  ;;  %578 = vset.pattern.permute.xlu0 (!%p177_p3), %v620_v2  ;;  %v229_v3 = vshrl.u32 (!%p177_p3), %v228_v1, 7  ;;  %s621_s6 = smov (!%p177_p3), 112   ;;  %519 = vmatprep.subr.bf16.mxu0 (!%p177_p3), %v624_v12  ;;  %vm629_vm3 = vmmov (!%p177_p3), 0  }
   0xb   : > { %v245_v4 = vsel (!%p177_p3), %vm226_vm1, 1, %v620_v2  ;;  %v227_v5 = vsel (!%p177_p3), %vm225_vm0, 1, %v620_v2  ;;  %s495_s27 = sshll.u32 (!%p177_p3), %s219_s25, 2  ;;  %s622_s7 = smov (!%p177_p3), 126   ;;  %v630_v13 = vmov (!%p177_p3), 0.0   ;;  %v318_v14 = vld [vmem:[%s748_s2] sm:$0xff] (!%p177_p3) }
   0xc   : > { %v230_v6 = vsub.s32 (!%p177_p3), 0, %v229_v3  ;;  %s623_s8 = smov (!%p177_p3), 127   ;;  %s625_s9 = smov (!%p177_p3), 110   ;;  %516 = vmatprep.mubr.msk.f32.mxu0 (!%p177_p3), %vm629_vm3, %v630_v13  ;;  %vm264_vm4 = vcmask (!%p177_p3), 916480   ;;  %vm241_vm5 = vcmask (!%p177_p3), 1039360   ;;  %vm255_vm6 = vcmask (!%p177_p3), 1031168  }
   0xd   : > { %s626_s10 = smov (!%p177_p3), 96   ;;  %s627_s11 = smov (!%p177_p3), 111   ;;  %vm281_vm8 = vcmask (!%p177_p3), 900096   ;;  %vm290_vm9 = vcmask (!%p177_p3), 785408   ;;  %vm273_vm10 = vcmask (!%p177_p3), 908288   ;;  %vm299_vm11 = vcmask (!%p177_p3), 777216  }
   0xe   : > { %v699_v7 = vrot.slane (!%p177_p3), %v227_v5, %v230_v6  ;;  %v701_v8 = vrot.slane (!%p177_p3), %v245_v4, %v230_v6  ;;  %s628_s12 = smov (!%p177_p3), 95   ;;  %s631_s13 = smov (!%p177_p3), 94   ;;  %vm307_vm12 = vcmask (!%p177_p3), 769024   ;;  %vm328_vm13 = vcmask (!%p177_p3), 1043456   ;;  %v312_v51 = vld [vmem:[%s747_s1] sm:$0xff] (!%p177_p3) }
   0xf   : > { %vm324_vm14 = vcmask (!%p177_p3), 293888   ;;  %p212_p6 = scmp.lt.s32.totalorder (!%p177_p3), %s602_s15, 1 }
  0x10   : > { %s762_s16 = smov (!%p205_p5, %s606_s16), 1  ;;  %vm232_vm2 = vcmp.eq.s32.totalorder %v699_v7, 1  ;;  %vm250_vm7 = vcmp.eq.s32.totalorder %v701_v8, 1 }
  0x11   : > { %s525_s26 = smul.u32 12, %s762_s16  ;;  %s764_s15 = smov (!%p212_p6, %s602_s15), 1 }
  0x12   : > { %s492_s25 = sshll.u32 %s762_s16, 1 }
  0x13   : > { %s209_s30 = scalar_lea.vmem %s746_s0, %s525_s26  ;;  %s215_s26 = sadd.s32 %s492_s25, %s764_s15 }
  0x14   : > { %s222_s5 = scalar_lea.vmem %s209_s30, %s495_s27  ;;  %s493_s27 = sshll.u32 %s215_s26, 3 }
  0x15   : > { %v223_v9 = vld [vmem:[%s222_s5] sm:$0xff]  ;;  %s217_s30 = scalar_lea.vmem %s750_s4, %s493_s27 }
  0x16   : > { %260 = vrot.lane.b32.xlu1 %v223_v9, %s621_s6  ;;  %251 = vrot.lane.b32.xlu0 %v223_v9, %s622_s7  ;;  %v236_v10 = vcombine.high %v223_v9, %v223_v9  ;;  %v233_v11 = vsel %vm232_vm2, %v223_v9, 0.0 }
  0x17   : > { %234 = vst [vmem:[#allocation2] sm:$0xf] %v233_v11 }
  0x1a   : > { %237 = vrot.lane.b32.xlu0 %v223_v9, %s623_s8  ;;  %262 = vrot.lane.b32.xlu1 %v236_v10, %s621_s6 }
  0x1e   : > { %239 = vrot.lane.b32.xlu1 %v236_v10, %s623_s8  ;;  %253 = vrot.lane.b32.xlu0 %v236_v10, %s622_s7 }
  0x22   : > { %279 = vrot.lane.b32.xlu1 %v236_v10, %s625_s9  ;;  %277 = vrot.lane.b32.xlu0 %v223_v9, %s625_s9 }
  0x26   : > { %288 = vrot.lane.b32.xlu1 %v236_v10, %s626_s10  ;;  %286 = vrot.lane.b32.xlu0 %v223_v9, %s626_s10 }
  0x2a   : > { %271 = vrot.lane.b32.xlu1 %v236_v10, %s627_s11  ;;  %269 = vrot.lane.b32.xlu0 %v223_v9, %s627_s11 }
  0x2e   : > { %297 = vrot.lane.b32.xlu1 %v236_v10, %s628_s12  ;;  %295 = vrot.lane.b32.xlu0 %v223_v9, %s628_s12 }
  0x32   : > { %305 = vrot.lane.b32.xlu1 %v236_v10, %s631_s13  ;;  %303 = vrot.lane.b32.xlu0 %v223_v9, %s631_s13 }
  0x36   : > { %321 = vperm.xlu0 %578, %v318_v14  }
  0x88   : > { %v261_v15 = vpop.permute.xlu1 %260  ;;  %v252_v16 = vpop.permute.xlu0 %251 }
  0x8c   : > { %v238_v17 = vpop.permute.xlu0 %237  ;;  %v263_v18 = vpop.permute.xlu1 %262 }
  0x8d   : > { %v265_v19 = vsel %vm264_vm4, %v261_v15, %v263_v18 }
  0x8e   : > { %v267_v20 = vsel %vm232_vm2, %v265_v19, 0.0 }
  0x8f   : > { %268 = vst [vmem:[#allocation2 + $0xc] sm:$0xf] %v267_v20 }
  0x90   : > { %v240_v21 = vpop.permute.xlu1 %239  ;;  %v254_v22 = vpop.permute.xlu0 %253 }
  0x91   : > { %v242_v23 = vsel %vm241_vm5, %v238_v17, %v240_v21  ;;  %v256_v24 = vsel %vm255_vm6, %v252_v16, %v254_v22 }
  0x92   : > { %244 = vst [vmem:[#allocation2 + $0x4] sm:$0xf] %v242_v23  ;;  %v258_v25 = vsel %vm250_vm7, %v256_v24, 0.0 }
  0x93   : > { %259 = vst [vmem:[#allocation2 + $0x8] sm:$0xf] %v258_v25 }
  0x94   : > { %v280_v26 = vpop.permute.xlu1 %279  ;;  %v278_v27 = vpop.permute.xlu0 %277 }
  0x95   : > { %v282_v28 = vsel %vm281_vm8, %v278_v27, %v280_v26 }
  0x96   : > { %v284_v29 = vsel %vm250_vm7, %v282_v28, 0.0 }
  0x97   : > { %285 = vst [vmem:[#allocation2 + $0x14] sm:$0xf] %v284_v29 }
  0x98   : > { %v289_v30 = vpop.permute.xlu1 %288  ;;  %v287_v31 = vpop.permute.xlu0 %286 }
  0x99   : > { %v291_v32 = vsel %vm290_vm9, %v287_v31, %v289_v30  ;;  %v313_v33 = vld [vmem:[#allocation2] sm:$0xff] }
  0x9a   : > { %v293_v34 = vsel %vm232_vm2, %v291_v32, 0.0  ;;  %v314_v35 = vld [vmem:[#allocation2 + $0x8] sm:$0xff] }
  0x9b   : > { %294 = vst [vmem:[#allocation2 + $0x18] sm:$0xf] %v293_v34  ;;  %v520_v36 = vpack.c.bf16 %v314_v35, %v313_v33 }
  0x9c   : > { %v272_v37 = vpop.permute.xlu1 %271  ;;  %v270_v38 = vpop.permute.xlu0 %269 }
  0x9d   : > { %v274_v39 = vsel %vm273_vm10, %v270_v38, %v272_v37  ;;  %521 = vmatpush3.bf16.msra.mxu0 %v520_v36 }
  0x9e   : > { %276 = vst [vmem:[#allocation2 + $0x10] sm:$0xf] %v274_v39  ;;  %522 = vmatprep.subr.bf16.mxu0 %v624_v12 }
  0xa0   : > { %v298_v40 = vpop.permute.xlu1 %297  ;;  %v296_v41 = vpop.permute.xlu0 %295 }
  0xa1   : > { %v300_v42 = vsel %vm299_vm11, %v296_v41, %v298_v40 }
  0xa2   : > { %302 = vst [vmem:[#allocation2 + $0x1c] sm:$0xf] %v300_v42 }
  0xa4   : > { %v306_v43 = vpop.permute.xlu1 %305  ;;  %v304_v44 = vpop.permute.xlu0 %303 }
  0xa5   : > { %v308_v45 = vsel %vm307_vm12, %v304_v44, %v306_v43  ;;  %v315_v47 = vld [vmem:[#allocation2 + $0x10] sm:$0xff] }
  0xa6   : > { %v310_v46 = vsel %vm250_vm7, %v308_v45, 0.0 }
  0xa7   : > { %311 = vst [vmem:[#allocation2 + $0x20] sm:$0xf] %v310_v46 }
  0xa9   : > { %v316_v48 = vld [vmem:[#allocation2 + $0x18] sm:$0xff] }
  0xaa   : > { %v523_v49 = vpack.c.bf16 %v316_v48, %v315_v47 }
  0xac   : > { %524 = vmatpush3.bf16.msra.mxu0 %v523_v49 }
  0xad   : > { %514 = vmatprep.subr.mxu0 %v630_v13 }
  0xae   : > { %v317_v50 = vld [vmem:[#allocation2 + $0x20] sm:$0xf] }
  0xb0   : > { %515 = vmatpush3.msk.msra.mxu0 %vm328_vm13, %v317_v50 }
  0xb1   : > { %517 = vmatmul.mubr.msk.f32.vlgmr.msra.gmra.mrb[0].mxu0 %vm324_vm14, %v312_v51 }
  0xb5   : > { %v322_v52 = vpop.permute.xlu0 %321 }
 0x184   : > { %v398_v53 = vpop.f32.mrb[0].mxu0 }
 0x185   : > { %v399_v54 = vadd.f32 %v398_v53, %v322_v52  ;;  %v518_v55 = vpop.f32.mrb[1].mxu0 }
 0x187   : > { %v402_v56 = vmax.f32 %v399_v54, 0.0 }
 0x189   : > { %403 = vst [vmem:[%s217_s30] sm:$0xff] %v402_v56 }
 0x18a PF: > { %s14_s19 = sadd.s32 1, %s618_s19   ;;  %s751_s15 = smov %s610_s17 }
 0x18b   : > { %p11_p7 = scmp.ge.s32.totalorder %s14_s19, 6   ;;  %s752_s16 = smov %s614_s18 }
 0x18c   : > { %s753_s17 = smov %s756_s20  ;;  %s754_s18 = smov %s760_s21 }
 0x18d   :  { %13 = sbr.rel (!%p11_p7) target bundleno = 3 (0x3), region = 67 }

</bundles_post_ra>
